<compile_context>
chip_gen: v6e
topology: v6e:2x2x1
jax: 0.10.0
libtpu: 0.0.40
codegen_flags: <defaults>
</compile_context>

<pallas_src>
import functools

import numpy as np

import jax
import jax.numpy as jnp
from jax.experimental import pallas as pl
from jax.experimental.pallas import tpu as pltpu


_TILE_TARGET_BYTES = 4 << 20     # ~4 MiB row blocks (amortize ~0.35 us/step)
_VMEM_LIMIT_BYTES = 32 << 20     # 2x(in) + 2x(out) 4 MiB buffers + perm + slack
                                 # (raises v5e's 16 MiB default; == default on
                                 # v6e/v7x, well under physical VMEM everywhere)


# ----------------------------------------------------------------------------
# Small helpers
# ----------------------------------------------------------------------------
def _cdiv(a, b):
    return -(-a // b)


def _round_up(a, b):
    return _cdiv(a, b) * b


def _sublane_quantum(dtype):
    """Native sublane tile height for this dtype (8 for 32-bit, 16 for 16-bit,
    32 for 8-bit) so row blocks line up with the packed VMEM layout."""
    return 8 * max(1, 4 // jnp.dtype(dtype).itemsize)


def _plan_row_tile(rows, row_bytes, q):
    """Row-tile: ~<=4 MiB blocks, multiple of the sublane quantum, never an
    over-hanging first block, and >= 2 blocks when possible (v7x: 2 TCs on the
    'parallel' row axis; no effect on 1-TC v5e/v6e)."""
    if rows <= q:
        return rows                               # single full-dim block
    tm = (_TILE_TARGET_BYTES // max(row_bytes, 1)) // q * q
    tm = max(q, min(tm, (rows // q) * q))
    if rows >= 2 * q and _cdiv(rows, tm) < 2:
        tm = _round_up(_cdiv(rows, 2), q)
    return tm


@functools.lru_cache(maxsize=None)
def _group_reverse_perm(group_w):
    """128x128 one-hot P with (x @ P)[:, j] = x[:, src(j)], where src reverses
    lanes within consecutive groups of `group_w` lanes.  Exact in bf16."""
    j = np.arange(128)
    src = (j // group_w) * group_w + (group_w - 1 - j % group_w)
    return (np.arange(128)[:, None] == src[None, :]).astype(np.float32)


def _mxu_plan(dtype):
    """(use_mxu_path, n_split).  n_split==1: one exact bf16 matmul (bf16,
    8-bit ints, bool).  n_split==3: hi/mid/lo bf16 split of f32/f16 values so
    the permutation is bit-exact regardless of matmul precision handling."""
    d = jnp.dtype(dtype)
    if d == jnp.dtype(jnp.bfloat16) or (d.kind in "iub" and d.itemsize == 1):
        return True, 1
    if d == jnp.dtype(jnp.float32) or d == jnp.dtype(jnp.float16):
        return True, 3
    return False, 0          # wide ints / f64 / ... -> exact lane-reverse path


# ----------------------------------------------------------------------------
# Kernels
# ----------------------------------------------------------------------------
def _mxu_flip_kernel(flag_ref, perm_ref, x_ref, o_ref, *, n_split):
    """Reverse lanes within groups inside each 128-lane block via a one-hot
    MXU matmul; 128-lane block ordering is handled by the output index_map.
    Pass-through when the prefetched flip flag is 0."""

    @pl.when(flag_ref[0] == 0)
    def _passthrough():
        o_ref[...] = x_ref[...]

    @pl.when(flag_ref[0] != 0)
    def _flip():
        perm = perm_ref[...]                       # bf16 one-hot, resident
        if n_split == 1:
            y = jnp.dot(x_ref[...].astype(jnp.bfloat16), perm,
                        preferred_element_type=jnp.float32)
        else:
            # Error-free hi/mid/lo bf16 split of f32/f16 values: with one-hot
            # weights and f32 accumulation the result is bit-exact for finite,
            # normal inputs independent of MXU precision modes.
            # TODO(synk): subnormal / non-finite f32 pixels are not preserved
            # bit-exactly on this path (real image data never contains them).
            x = x_ref[...].astype(jnp.float32)
            hi = x.astype(jnp.bfloat16)
            r1 = x - hi.astype(jnp.float32)
            mid = r1.astype(jnp.bfloat16)
            lo = (r1 - mid.astype(jnp.float32)).astype(jnp.bfloat16)
            y = jnp.dot(hi, perm, preferred_element_type=jnp.float32)
            y = y + jnp.dot(mid, perm, preferred_element_type=jnp.float32)
            y = y + jnp.dot(lo, perm, preferred_element_type=jnp.float32)
        o_ref[...] = y.astype(o_ref.dtype)


def _rev_flip_kernel(flag_ref, x_ref, o_ref):
    """Fallback: exact lane reverse of a full-width row block.  Only used for
    dtypes/widths the MXU path does not cover (wide ints, W neither dividing
    nor a multiple of 128)."""

    @pl.when(flag_ref[0] == 0)
    def _passthrough():
        o_ref[...] = x_ref[...]

    @pl.when(flag_ref[0] != 0)
    def _flip():
        # TODO(synk): relies on Mosaic lowering lax.rev on the lane axis; not
        # exercised by the self-test (all tested dtypes take the MXU path).
        o_ref[...] = jnp.flip(x_ref[...], axis=-1)


# ----------------------------------------------------------------------------
# 2-D drivers (one pallas_call per array, no pad / concat / slice)
# ----------------------------------------------------------------------------
def _flip2d_mxu(flag, xf, group_w, n_split):
    """xf: (rows, 128 * nwb).  Reverse groups of `group_w` lanes inside each
    128-lane column block in-kernel; reverse the column-block order (nwb > 1)
    through the flag-dependent output index_map."""
    rows, wf = xf.shape
    nwb = wf // 128
    itemsize = jnp.dtype(xf.dtype).itemsize
    tm = _plan_row_tile(rows, 128 * itemsize, _sublane_quantum(xf.dtype))
    perm = jnp.asarray(_group_reverse_perm(group_w), dtype=jnp.bfloat16)

    if nwb == 1:
        out_map = lambda i, j, flag_ref: (i, j)
        aliases = {2: 0}       # identity block mapping -> in-place is safe
    else:
        out_map = lambda i, j, flag_ref: (i, j + flag_ref[0] * (nwb - 1 - 2 * j))
        aliases = {}           # reversed column blocks: do NOT alias

    return pl.pallas_call(
        functools.partial(_mxu_flip_kernel, n_split=n_split),
        out_shape=jax.ShapeDtypeStruct((rows, wf), xf.dtype),
        grid_spec=pltpu.PrefetchScalarGridSpec(
            num_scalar_prefetch=1,
            grid=(_cdiv(rows, tm), nwb),
            in_specs=[
                # Constant block index -> fetched once, stays VMEM-resident.
                pl.BlockSpec((128, 128), lambda i, j, flag_ref: (0, 0)),
                pl.BlockSpec((tm, 128), lambda i, j, flag_ref: (i, j)),
            ],
            out_specs=pl.BlockSpec((tm, 128), out_map),
        ),
        compiler_params=pltpu.CompilerParams(
            dimension_semantics=("parallel", "arbitrary"),
            vmem_limit_bytes=_VMEM_LIMIT_BYTES),
        input_output_aliases=aliases,
    )(flag, perm, xf)


def _flip2d_rev(flag, x2d):
    rows, w = x2d.shape
    itemsize = jnp.dtype(x2d.dtype).itemsize
    tm = _plan_row_tile(rows, w * itemsize, _sublane_quantum(x2d.dtype))
    return pl.pallas_call(
        _rev_flip_kernel,
        out_shape=jax.ShapeDtypeStruct((rows, w), x2d.dtype),
        grid_spec=pltpu.PrefetchScalarGridSpec(
            num_scalar_prefetch=1,
            grid=(_cdiv(rows, tm),),
            in_specs=[pl.BlockSpec((tm, w), lambda i, flag_ref: (i, 0))],
            out_specs=pl.BlockSpec((tm, w), lambda i, flag_ref: (i, 0)),
        ),
        compiler_params=pltpu.CompilerParams(
            dimension_semantics=("parallel",),
            vmem_limit_bytes=_VMEM_LIMIT_BYTES),
        input_output_aliases={1: 0},   # identity mapping -> in-place is safe
    )(flag, x2d)


@jax.jit
def _hflip_nd(flag, x):
    """Conditionally flip `x` along its last axis (flag: (1,) int32 in SMEM)."""
    w = x.shape[-1]
    m = x.size // w
    use_mxu, n_split = _mxu_plan(x.dtype)
    if use_mxu and w < 128 and 128 % w == 0 and (m * w) % 128 == 0:
        # Narrow width: fold 128//w rows into one lane-dense 128-lane row
        # (metadata-only reshape) and reverse w-lane groups in-kernel.
        y = _flip2d_mxu(flag, x.reshape(m * w // 128, 128), w, n_split)
    elif use_mxu and w % 128 == 0:
        y = _flip2d_mxu(flag, x.reshape(m, w), 128, n_split)
    else:
        y = _flip2d_rev(flag, x.reshape(m, w))
    return y.reshape(x.shape)


# ----------------------------------------------------------------------------
# Public API (mirrors the torch module's forward)
# ----------------------------------------------------------------------------
def _hflip_arrays(arrays, flag):
    return [_hflip_nd(flag, a) for a in arrays]


def random_horizontal_flip(key, liver_imgs, liver_mask=None, p=0.5):
    """Forward pass of RandomHorizontalFlip: one shared Bernoulli(p) draw
    decides whether every image tensor and the mask are flipped along their
    last (width) axis."""
    flag = (jax.random.uniform(key, ()) < p).astype(jnp.int32).reshape((1,))

    imgs_list = liver_imgs if isinstance(liver_imgs, list) else [liver_imgs]
    if liver_mask is None:
        mask_list = []
    else:
        mask_list = liver_mask if isinstance(liver_mask, list) else [liver_mask]

    flipped = _hflip_arrays(list(imgs_list) + list(mask_list), flag)
    out_imgs_list = flipped[:len(imgs_list)]
    out_mask_list = flipped[len(imgs_list):]

    out_imgs = out_imgs_list if isinstance(liver_imgs, list) else out_imgs_list[0]
    if liver_mask is None:
        out_mask = None
    elif isinstance(liver_mask, list):
        out_mask = out_mask_list
    else:
        out_mask = out_mask_list[0]
    return out_imgs, out_mask


# ----------------------------------------------------------------------------
# Self-test
# ----------------------------------------------------------------------------
if __name__ == "__main__":
    key = jax.random.PRNGKey(0)
    k_img, k_mask, k_wide, k_u8, k_coin = jax.random.split(key, 5)

    # Narrow width (W=16): lane-dense folded MXU path, arbitrary f32 values.
    imgs = jax.random.normal(k_img, (2, 4, 16, 16), dtype=jnp.float32)
    mask = (jax.random.uniform(k_mask, (2, 1, 16, 16)) > 0.5).astype(jnp.float32)

    flag1 = jnp.array([1], dtype=jnp.int32)
    flag0 = jnp.array([0], dtype=jnp.int32)

    f_imgs, f_mask = _hflip_arrays([imgs, mask], flag1)
    p_imgs, p_mask = _hflip_arrays([imgs, mask], flag0)
    jax.block_until_ready((f_imgs, f_mask, p_imgs, p_mask))
    assert f_imgs.shape == imgs.shape and f_imgs.dtype == imgs.dtype
    assert jnp.array_equal(f_imgs, imgs[..., ::-1])   # bit-exact for arbitrary f32
    assert jnp.array_equal(f_mask, mask[..., ::-1])
    assert jnp.array_equal(p_imgs, imgs)
    assert jnp.array_equal(p_mask, mask)

    # Wide width (W=256, multiple of 128): column-block-reversed path, bf16.
    wide = jax.random.normal(k_wide, (2, 3, 8, 256), dtype=jnp.bfloat16)
    f_wide = _hflip_nd(flag1, wide)
    p_wide = _hflip_nd(flag0, wide)
    jax.block_until_ready((f_wide, p_wide))
    assert jnp.array_equal(f_wide, wide[..., ::-1])
    assert jnp.array_equal(p_wide, wide)

    # 8-bit (uint8 mask-style) data stays exact through the bf16 MXU path.
    u8 = jax.random.randint(k_u8, (2, 4, 16, 16), 0, 256,
                            dtype=jnp.int32).astype(jnp.uint8)
    f_u8 = _hflip_nd(flag1, u8)
    jax.block_until_ready(f_u8)
    assert f_u8.dtype == jnp.uint8
    assert jnp.array_equal(f_u8, u8[..., ::-1])

    # Full forward pass with the module's single shared coin flip.
    out_imgs, out_mask = random_horizontal_flip(k_coin, imgs, mask, p=0.5)
    jax.block_until_ready((out_imgs, out_mask))
    did_flip = bool(jax.random.uniform(k_coin, ()) < 0.5)
    ref_imgs = imgs[..., ::-1] if did_flip else imgs
    ref_mask = mask[..., ::-1] if did_flip else mask
    assert out_imgs.shape == imgs.shape and out_imgs.dtype == imgs.dtype
    assert out_mask.shape == mask.shape and out_mask.dtype == mask.dtype
    assert jnp.array_equal(out_imgs, ref_imgs)
    assert jnp.array_equal(out_mask, ref_mask)

    # List input: the same shared flip is applied to every list element.
    out_list, _ = random_horizontal_flip(k_coin, [imgs, imgs * 2.0], None, p=0.5)
    jax.block_until_ready(out_list)
    assert jnp.array_equal(out_list[0], ref_imgs)
    assert jnp.array_equal(out_list[1], ref_imgs * 2.0)

    print("KERNEL_OK")
</pallas_src>

<mosaic_0001>
module attributes {stable_mosaic.version = 11 : i64} {
  func.func @_mxu_flip_kernel(%arg0: i32, %arg1: i32, %arg2: memref<1xi32, #tpu.memory_space<smem>>, %arg3: memref<128x128xbf16, #tpu.memory_space<vmem>>, %arg4: memref<8x128xf32, #tpu.memory_space<vmem>>, %arg5: memref<8x128xf32, #tpu.memory_space<vmem>>) attributes {dimension_semantics = [#tpu.dimension_semantics<parallel>, #tpu.dimension_semantics<arbitrary>], iteration_bounds = array<i64: 2, 1>, scalar_prefetch = 1 : i64, scratch_operands = 0 : i64, tpu.core_type = #tpu.core_type<tc>, window_params = [{pipeline_mode = #tpu.pipeline_mode<synchronous>, transform_indices = @transform_0, window_bounds = array<i64: 128, 128>}, {transform_indices = @transform_1, window_bounds = array<i64: 8, 128>}, {transform_indices = @transform_2, window_bounds = array<i64: 8, 128>}]} {
    %c0 = arith.constant 0 : index
    %0 = memref.load %arg2[%c0] : memref<1xi32, #tpu.memory_space<smem>>
    %c0_i32 = arith.constant 0 : i32
    %1 = arith.cmpi eq, %0, %c0_i32 : i32
    %2 = arith.extui %1 : i1 to i32
    %c0_i32_0 = arith.constant 0 : i32
    %3 = arith.cmpi ne, %2, %c0_i32_0 : i32
    scf.if %3 {
      %c0_4 = arith.constant 0 : index
      %c0_5 = arith.constant 0 : index
      %8 = vector.load %arg4[%c0_4, %c0_5] : memref<8x128xf32, #tpu.memory_space<vmem>>, vector<8x128xf32>
      %c0_6 = arith.constant 0 : index
      %c0_7 = arith.constant 0 : index
      %9 = vector.load %arg5[%c0_6, %c0_7] : memref<8x128xf32, #tpu.memory_space<vmem>>, vector<8x128xf32>
      tpu.vector_store %arg5[%c0_6, %c0_7], %8 {strides = array<i32>} : memref<8x128xf32, #tpu.memory_space<vmem>>, vector<8x128xf32>,
    } else {
    }
    %c0_1 = arith.constant 0 : index
    %4 = memref.load %arg2[%c0_1] : memref<1xi32, #tpu.memory_space<smem>>
    %c0_i32_2 = arith.constant 0 : i32
    %5 = arith.cmpi ne, %4, %c0_i32_2 : i32
    %6 = arith.extui %5 : i1 to i32
    %c0_i32_3 = arith.constant 0 : i32
    %7 = arith.cmpi ne, %6, %c0_i32_3 : i32
    scf.if %7 {
      %c0_4 = arith.constant 0 : index
      %c0_5 = arith.constant 0 : index
      %8 = vector.load %arg3[%c0_4, %c0_5] : memref<128x128xbf16, #tpu.memory_space<vmem>>, vector<128x128xbf16>
      %c0_6 = arith.constant 0 : index
      %c0_7 = arith.constant 0 : index
      %9 = vector.load %arg4[%c0_6, %c0_7] : memref<8x128xf32, #tpu.memory_space<vmem>>, vector<8x128xf32>
      %10 = arith.truncf %9 : vector<8x128xf32> to vector<8x128xbf16>
      %11 = arith.extf %10 : vector<8x128xbf16> to vector<8x128xf32>
      %12 = arith.subf %9, %11 : vector<8x128xf32>
      %13 = arith.truncf %12 : vector<8x128xf32> to vector<8x128xbf16>
      %14 = arith.extf %13 : vector<8x128xbf16> to vector<8x128xf32>
      %15 = arith.subf %12, %14 : vector<8x128xf32>
      %16 = arith.truncf %15 : vector<8x128xf32> to vector<8x128xbf16>
      %cst = arith.constant dense<0.000000e+00> : vector<8x128xf32>
      %17 = tpu.matmul %10, %8, %cst {dimension_numbers = #tpu.dot_dimension_numbers<[1], [0], [0], [1], [0, 0, 1, 1], [], []>} : vector<8x128xbf16>, vector<128x128xbf16>, vector<8x128xf32> -> vector<8x128xf32>
      %cst_8 = arith.constant dense<0.000000e+00> : vector<8x128xf32>
      %18 = tpu.matmul %13, %8, %cst_8 {dimension_numbers = #tpu.dot_dimension_numbers<[1], [0], [0], [1], [0, 0, 1, 1], [], []>} : vector<8x128xbf16>, vector<128x128xbf16>, vector<8x128xf32> -> vector<8x128xf32>
      %19 = arith.addf %17, %18 : vector<8x128xf32>
      %cst_9 = arith.constant dense<0.000000e+00> : vector<8x128xf32>
      %20 = tpu.matmul %16, %8, %cst_9 {dimension_numbers = #tpu.dot_dimension_numbers<[1], [0], [0], [1], [0, 0, 1, 1], [], []>} : vector<8x128xbf16>, vector<128x128xbf16>, vector<8x128xf32> -> vector<8x128xf32>
      %21 = arith.addf %19, %20 : vector<8x128xf32>
      %c0_10 = arith.constant 0 : index
      %c0_11 = arith.constant 0 : index
      %22 = vector.load %arg5[%c0_10, %c0_11] : memref<8x128xf32, #tpu.memory_space<vmem>>, vector<8x128xf32>
      tpu.vector_store %arg5[%c0_10, %c0_11], %21 {strides = array<i32>} : memref<8x128xf32, #tpu.memory_space<vmem>>, vector<8x128xf32>,
    } else {
    }
    return
  }
  func.func @transform_0(%arg0: i32, %arg1: i32, %arg2: memref<1xi32, #tpu.memory_space<smem>>) -> (i32, i32) {
    %c0_i32 = arith.constant 0 : i32
    %c0_i32_0 = arith.constant 0 : i32
    %c0_i32_1 = arith.constant 0 : i32
    return %c0_i32, %c0_i32_0 : i32, i32
  }
  func.func @transform_1(%arg0: i32, %arg1: i32, %arg2: memref<1xi32, #tpu.memory_space<smem>>) -> (i32, i32) {
    %c0_i32 = arith.constant 0 : i32
    return %arg0, %arg1 : i32, i32
  }
  func.func @transform_2(%arg0: i32, %arg1: i32, %arg2: memref<1xi32, #tpu.memory_space<smem>>) -> (i32, i32) {
    %c0_i32 = arith.constant 0 : i32
    return %arg0, %arg1 : i32, i32
  }
}

</mosaic_0001>

<bundles_post_ra>
// kernel: _hflip_nd.1
= control target key start
LH: loop header
LB: loop body
LE: loop exit
PB: predicated region body
PF: predicated region fallthrough
CT: control target
= control target key end

     0   :  { %s642_s14 = smov 0   ;;  %s644_s15 = smov 0   ;;  %s737_s0 = inlined_call_operand.<no memory space> [shape: s32[1], index: 0, kind: input, shape index: {}]   ;;  %s738_s1 = inlined_call_operand.vmem [shape: bf16[128,128], index: 1, kind: input, shape index: {}]   ;;  %s739_s2 = inlined_call_operand.vmem [shape: f32[16,128], index: 2, kind: input, shape index: {}, may-alias: {2,3}]   ;;  %s740_s3 = inlined_call_operand.vmem [shape: f32[16,128], index: 3, kind: output, shape index: {}, may-alias: {2,3}]  }
   0x1   :  { %8 = sst [smem:[#allocation3]] %s737_s0  ;;  %s646_s16 = smov 0  }
   0x2 LB: > { %s26_s0 = sadd.s32 1, %s611_s15  ;;  %p457_p0 = scmp.ge.s32.totalorder %s615_s16, 1  ;;  %s615_s16 = sphi %s646_s16, %s14_s16   ;;  %s611_s15 = sphi %s644_s15, %s742_s15   ;;  %s607_s14 = sphi %s642_s14, %s741_s14  }
   0x3   : > { %p28_p1 = scmp.ge.s32.totalorder %s26_s0, 2  ;;  %p132_p2 = scmp.lt.s32.totalorder %s615_s16, 3 }
   0x5   : > { %s744_s0 = smov (%p28_p1, %s26_s0), 0  ;;  %p133_p3 = pnand %p457_p0, %p132_p2 }
   0x6   : > { %p158_p4 = scmp.lt.s32.totalorder (!%p133_p3), %s607_s14, 1  ;;  %s173_s17 = sld [smem:[#allocation3]] (!%p133_p3) }
   0x7   : > { %136 = sbr.rel (%p133_p3) target bundleno = 299 (0x12b), region = 28 }
   0xc   : > { %s746_s14 = smov (!%p158_p4, %s607_s14), 1  ;;  %p460_p5 = scmp.ne.s32.totalorder %s173_s17, 0 }
   0xd   : > { %s458_s18 = sshll.u32 %s746_s14, 3 }
   0xe   : > { %s663_s21 = scalar_lea.vmem %s739_s2, %s458_s18  ;;  %s668_s24 = scalar_lea.vmem %s740_s3, %s458_s18 }
   0xf   : > { %177 = sbr.rel (%p460_p5) target bundleno = 22 (0x16), region = 32 }
  0x14   : > { %v178_v0 = vld [vmem:[%s663_s21] sm:$0xff] }
  0x15   : > { %179 = vst [vmem:[%s668_s24] sm:$0xff] %v178_v0 }
  0x16 PF: > { %s180_s25 = sld [smem:[#allocation3]] }
  0x1c   : > { %p461_p6 = scmp.eq.s32.totalorder %s180_s25, 0 }
  0x1e   : > { %184 = sbr.rel (%p461_p6) target bundleno = 299 (0x12b), region = 36 }
  0x23   : > { %v585_v1 = vld [vmem:[%s738_s1 + $0x38] sm:$0xff]   ;;  %v617_v2 = vmov 0.0   ;;  %v586_v3 = vld [vmem:[%s738_s1 + $0x30] sm:$0xff]   ;;  %vm618_vm0 = vmmov 0   ;;  %v587_v4 = vld [vmem:[%s738_s1 + $0x28] sm:$0xff]  }
  0x24   : > { %499 = vmatprep.subr.bf16.mxu0 %v617_v2  ;;  %519 = vmatprep.subr.bf16.mxu1 %v617_v2  ;;  %v588_v5 = vld [vmem:[%s738_s1 + $0x20] sm:$0xff]   ;;  %v589_v6 = vld [vmem:[%s738_s1 + $0x18] sm:$0xff]   ;;  %v590_v9 = vld [vmem:[%s738_s1 + $0x10] sm:$0xff]  }
  0x25   : > { %500 = vmatpush3.bf16.msra.mxu0 %v585_v1  ;;  %520 = vmatpush3.bf16.msra.mxu1 %v585_v1  ;;  %v201_v7 = vld [vmem:[%s663_s21] sm:$0xff]  ;;  %v591_v11 = vld [vmem:[%s738_s1 + $0x8] sm:$0xff]  }
  0x26   : > { %501 = vmatprep.subr.bf16.mxu0 %v617_v2  ;;  %521 = vmatprep.subr.bf16.mxu1 %v617_v2  ;;  %v202_v8 = vpack.c.bf16 %v201_v7, %v201_v7  ;;  %v592_v13 = vld [vmem:[%s738_s1] sm:$0xff]  }
  0x27   : > { %515 = vmatprep.mubr.msk.bf16.mxu0 %vm618_vm0, %v617_v2  ;;  %535 = vmatprep.mubr.msk.bf16.mxu1 %vm618_vm0, %v617_v2 }
  0x28   : > { %v203_v10 = vunpack.c.l.bf16 %v202_v8 }
  0x29   : > { %502 = vmatpush3.bf16.msra.mxu0 %v586_v3  ;;  %522 = vmatpush3.bf16.msra.mxu1 %v586_v3 }
  0x2a   : > { %503 = vmatprep.subr.bf16.mxu0 %v617_v2  ;;  %523 = vmatprep.subr.bf16.mxu1 %v617_v2  ;;  %v204_v12 = vsub.f32 %v201_v7, %v203_v10 }
  0x2c   : > { %v205_v14 = vpack.c.bf16 %v204_v12, %v204_v12 }
  0x2d   : > { %504 = vmatpush3.bf16.msra.mxu0 %v587_v4  ;;  %524 = vmatpush3.bf16.msra.mxu1 %v587_v4 }
  0x2e   : > { %505 = vmatprep.subr.bf16.mxu0 %v617_v2  ;;  %525 = vmatprep.subr.bf16.mxu1 %v617_v2  ;;  %v206_v15 = vunpack.c.l.bf16 %v205_v14 }
  0x30   : > { %v207_v16 = vsub.f32 %v204_v12, %v206_v15 }
  0x31   : > { %506 = vmatpush3.bf16.msra.mxu0 %v588_v5  ;;  %526 = vmatpush3.bf16.msra.mxu1 %v588_v5 }
  0x32   : > { %507 = vmatprep.subr.bf16.mxu0 %v617_v2  ;;  %527 = vmatprep.subr.bf16.mxu1 %v617_v2  ;;  %v208_v17 = vpack.c.bf16 %v207_v16, %v207_v16 }
  0x35   : > { %508 = vmatpush3.bf16.msra.mxu0 %v589_v6  ;;  %528 = vmatpush3.bf16.msra.mxu1 %v589_v6 }
  0x36   : > { %509 = vmatprep.subr.bf16.mxu0 %v617_v2  ;;  %529 = vmatprep.subr.bf16.mxu1 %v617_v2 }
  0x39   : > { %510 = vmatpush3.bf16.msra.mxu0 %v590_v9  ;;  %530 = vmatpush3.bf16.msra.mxu1 %v590_v9 }
  0x3a   : > { %511 = vmatprep.subr.bf16.mxu0 %v617_v2  ;;  %531 = vmatprep.subr.bf16.mxu1 %v617_v2 }
  0x3d   : > { %512 = vmatpush3.bf16.msra.mxu0 %v591_v11  ;;  %532 = vmatpush3.bf16.msra.mxu1 %v591_v11 }
  0x3e   : > { %513 = vmatprep.subr.bf16.mxu0 %v617_v2  ;;  %533 = vmatprep.subr.bf16.mxu1 %v617_v2 }
  0x41   : > { %514 = vmatpush3.bf16.msra.mxu0 %v592_v13  ;;  %534 = vmatpush3.bf16.msra.mxu1 %v592_v13 }
  0x42   : > { %539 = vmatprep.subr.bf16.mxu0 %v617_v2 }
  0x44   : > { %516 = vmatmul.mubr.bf16.vlgmr.msra.gmra.mxu0 %v205_v14  ;;  %536 = vmatmul.mubr.bf16.vlgmr.msra.gmra.mxu1 %v202_v8 }
  0x45   : > { %540 = vmatpush3.bf16.msra.mxu0 %v585_v1  ;;  %555 = vmatprep.mubr.msk.bf16.mxu0 %vm618_vm0, %v617_v2 }
  0x46   : > { %541 = vmatprep.subr.bf16.mxu0 %v617_v2 }
  0x49   : > { %542 = vmatpush3.bf16.msra.mxu0 %v586_v3 }
  0x4a   : > { %543 = vmatprep.subr.bf16.mxu0 %v617_v2 }
  0x4d   : > { %544 = vmatpush3.bf16.msra.mxu0 %v587_v4 }
  0x4e   : > { %545 = vmatprep.subr.bf16.mxu0 %v617_v2 }
  0x51   : > { %546 = vmatpush3.bf16.msra.mxu0 %v588_v5 }
  0x52   : > { %547 = vmatprep.subr.bf16.mxu0 %v617_v2 }
  0x55   : > { %548 = vmatpush3.bf16.msra.mxu0 %v589_v6 }
  0x56   : > { %549 = vmatprep.subr.bf16.mxu0 %v617_v2 }
  0x59   : > { %550 = vmatpush3.bf16.msra.mxu0 %v590_v9 }
  0x5a   : > { %551 = vmatprep.subr.bf16.mxu0 %v617_v2 }
  0x5d   : > { %552 = vmatpush3.bf16.msra.mxu0 %v591_v11 }
  0x5e   : > { %553 = vmatprep.subr.bf16.mxu0 %v617_v2 }
  0x61   : > { %554 = vmatpush3.bf16.msra.mxu0 %v592_v13 }
  0x64   : > { %556 = vmatmul.mubr.bf16.vlgmr.msra.gmra.mxu0 %v208_v17 }
 0x104   : > { %v291_v18 = vpop.f32.mrf.mxu0  ;;  %v331_v19 = vpop.f32.mrf.mxu1 }
 0x105   : > { %v332_v26 = vadd.f32 %v331_v19, %v291_v18 }
 0x106   : > { %v517_v20 = vpop.f32.mrf.mxu0  ;;  %v537_v21 = vpop.f32.mrf.mxu1 }
 0x108   : > { %v294_v22 = vpop.f32.mrf.mxu0  ;;  %v334_v23 = vpop.f32.mrf.mxu1 }
 0x10a   : > { %v518_v24 = vpop.f32.mrf.mxu0  ;;  %v538_v25 = vpop.f32.mrf.mxu1 }
 0x124   : > { %v371_v27 = vpop.f32.mrf.mxu0 }
 0x125   : > { %v377_v28 = vadd.f32 %v371_v27, %v332_v26 }
 0x126   : > { %v557_v29 = vpop.f32.mrf.mxu0 }
 0x127   : > { %378 = vst [vmem:[%s668_s24] sm:$0xff] %v377_v28 }
 0x128   : > { %v374_v30 = vpop.f32.mrf.mxu0 }
 0x12a   : > { %v558_v31 = vpop.f32.mrf.mxu0 }
 0x12b PF: > { %s14_s16 = sadd.s32 1, %s615_s16   ;;  %s741_s14 = smov %s611_s15 }
 0x12c   : > { %p11_p7 = scmp.ge.s32.totalorder %s14_s16, 4   ;;  %s742_s15 = smov %s744_s0 }
 0x12e   :  { %13 = sbr.rel (!%p11_p7) target bundleno = 2 (0x2), region = 66 }

</bundles_post_ra>
